<compile_context>
chip_gen: v6e
topology: v6e:2x2x1
jax: 0.10.0
libtpu: 0.0.40
codegen_flags: <defaults>
</compile_context>

<pallas_src>
import functools

import jax
import jax.numpy as jnp
import numpy as np
from jax import lax
from jax.experimental import pallas as pl
from jax.experimental.pallas import tpu as pltpu

_LANE = 128
_SUBLANE = 8
_CHUNK = _SUBLANE * _LANE                 # 1024-element granularity of base kernel
_DEF_OUT_TILE_ROWS = 8192                 # (8192,128) f32 = 4 MiB per buffer
_DEF_AUX_TILE_BYTES = 2 << 20             # ~2 MiB per aux input buffer (f32, lane-padded)
_SMALL_SIZE_THRESHOLD = 1 << 17           # below this, the pure-JAX path wins
_VMEM_LIMIT_BYTES = 32 * 1024 * 1024


def _cdiv(a, b):
    return -(-a // b)


def _round_up(x, m):
    return ((x + m - 1) // m) * m


def _partition(num_blocks):
    """Split the row-block axis into (parts, tiles_per_part)."""
    parts = 2 if num_blocks >= 2 else 1
    return parts, _cdiv(num_blocks, parts)


# ----------------------------- kernels ------------------------------------ #

def _neg_sum_kernel(x_ref, out_ref, acc_ref, *, scale, valid_rows, tile_rows,
                    tiles_per_part, needs_mask):
    """Accumulate sum(x) per part; write scale * sum at the last step."""
    j = pl.program_id(1)

    @pl.when(j == 0)
    def _():
        acc_ref[...] = jnp.zeros_like(acc_ref)

    x = x_ref[...].astype(jnp.float32)                       # (tile_rows, 128)
    if needs_mask:
        row0 = (pl.program_id(0) * tiles_per_part + j) * tile_rows
        row = row0 + lax.broadcasted_iota(jnp.int32, x.shape, 0)
        x = jnp.where(row < valid_rows, x, 0.0)              # select: garbage-safe

    # Pure-VPU per-step accumulation into one vreg-shaped accumulator; the
    # single cross-sublane/cross-lane XLU reduce happens only at finalize.
    acc_ref[...] += x.reshape(tile_rows // _SUBLANE, _SUBLANE, _LANE).sum(axis=0)

    @pl.when(j == pl.num_programs(1) - 1)
    def _():
        out_ref[...] = (jnp.sum(acc_ref[...]) * jnp.float32(scale)).reshape(1, 1, 1)


def _aux_sum_kernel(logit_ref, label_ref, out_ref, acc_ref, *, loss_type, scale,
                    valid_rows, tile_rows, tiles_per_part, needs_mask):
    """Accumulate the masked classification loss; write scale * sum at the end."""
    j = pl.program_id(1)

    @pl.when(j == 0)
    def _():
        acc_ref[...] = jnp.zeros_like(acc_ref)

    x = logit_ref[...].astype(jnp.float32)                   # (tile_rows, C)
    y = label_ref[...].astype(jnp.float32)

    if loss_type == "hinge":
        sign = y * 2.0 - 1.0
        elem = jnp.maximum(1.0 - x * sign, 0.0)
    else:  # "bce": numerically stable BCE-with-logits
        elem = jnp.maximum(x, 0.0) - x * y + jnp.log(1.0 + jnp.exp(-jnp.abs(x)))

    if needs_mask:
        row0 = (pl.program_id(0) * tiles_per_part + j) * tile_rows
        row = row0 + lax.broadcasted_iota(jnp.int32, elem.shape, 0)
        elem = jnp.where(row < valid_rows, elem, 0.0)

    # Per-step cross-sublane partial only; cross-lane reduce deferred to finalize.
    acc_ref[...] += jnp.sum(elem, axis=0, keepdims=True)     # (1, C)

    @pl.when(j == pl.num_programs(1) - 1)
    def _():
        out_ref[...] = (jnp.sum(acc_ref[...]) * jnp.float32(scale)).reshape(1, 1, 1)


# ----------------------------- wrappers ------------------------------------ #

def _neg_mean_pallas(fake_out, *, max_tile_rows=_DEF_OUT_TILE_ROWS):
    """-mean(fake_out): lane-dense, tiled, 2-partial Pallas reduction (no pads)."""
    flat = jnp.ravel(fake_out)
    n = flat.size
    n_main = (n // _CHUNK) * _CHUNK          # (8*128)-aligned prefix -> kernel
    total = None

    if n_main > 0:
        rows = n_main // _LANE               # always a multiple of 8
        x2d = flat[:n_main].reshape(rows, _LANE)

        tile_rows = min(rows, max(_SUBLANE,
                                  (int(max_tile_rows) // _SUBLANE) * _SUBLANE))
        num_blocks = _cdiv(rows, tile_rows)
        parts, tiles_per_part = _partition(num_blocks)
        needs_mask = (parts * tiles_per_part * tile_rows) != rows
        last_block = num_blocks - 1

        kernel = functools.partial(
            _neg_sum_kernel, scale=-1.0 / float(n), valid_rows=rows,
            tile_rows=tile_rows, tiles_per_part=tiles_per_part,
            needs_mask=needs_mask)

        partials = pl.pallas_call(
            kernel,
            out_shape=jax.ShapeDtypeStruct((parts, 1, 1), jnp.float32),
            grid_spec=pltpu.PrefetchScalarGridSpec(
                num_scalar_prefetch=0,
                grid=(parts, tiles_per_part),
                in_specs=[pl.BlockSpec(
                    (tile_rows, _LANE),
                    lambda c, j: (jnp.minimum(c * tiles_per_part + j, last_block), 0))],
                out_specs=pl.BlockSpec((1, 1, 1), lambda c, j: (c, 0, 0)),
                scratch_shapes=[pltpu.VMEM((_SUBLANE, _LANE), jnp.float32)],
            ),
            compiler_params=pltpu.CompilerParams(
                dimension_semantics=("parallel", "arbitrary"),
                vmem_limit_bytes=_VMEM_LIMIT_BYTES),
        )(x2d)
        total = jnp.sum(partials)

    if n_main < n:  # ragged tail (< 1024 elements): plain JAX, no padding
        tail = -jnp.sum(flat[n_main:].astype(jnp.float32)) / jnp.float32(n)
        total = tail if total is None else total + tail
    return total


def _aux_loss_pallas(fake_logit, label, aux_weight, loss_type, *,
                     max_tile_rows=None):
    """auxWeight * classification loss as a row-tiled Pallas reduction (no pads)."""
    n_cols = fake_logit.shape[-1]
    logit2d = jnp.reshape(fake_logit, (-1, n_cols))
    label2d = jnp.reshape(label, (-1, n_cols))      # keep original label dtype
    n_rows = logit2d.shape[0]

    if max_tile_rows is None:
        c_pad = _round_up(n_cols, _LANE)            # physical lane padding in VMEM
        max_tile_rows = max(_SUBLANE,
                            (_DEF_AUX_TILE_BYTES // (4 * c_pad)) // _SUBLANE * _SUBLANE)
    max_tile_rows = max(_SUBLANE, (int(max_tile_rows) // _SUBLANE) * _SUBLANE)

    # Single full-extent row block (any size) or 8-aligned tiles + edge masking.
    tile_rows = n_rows if n_rows <= max_tile_rows else max_tile_rows
    num_blocks = _cdiv(n_rows, tile_rows)
    parts, tiles_per_part = _partition(num_blocks)
    needs_mask = (parts * tiles_per_part * tile_rows) != n_rows
    last_block = num_blocks - 1

    if loss_type == "hinge":
        scale = float(aux_weight) / float(n_rows)             # sum(-1).mean()
    else:  # "bce"
        scale = float(aux_weight) / float(n_rows * n_cols)    # mean over elements

    kernel = functools.partial(
        _aux_sum_kernel, loss_type=loss_type, scale=scale, valid_rows=n_rows,
        tile_rows=tile_rows, tiles_per_part=tiles_per_part, needs_mask=needs_mask)

    def _idx(c, j):
        return (jnp.minimum(c * tiles_per_part + j, last_block), 0)

    partials = pl.pallas_call(
        kernel,
        out_shape=jax.ShapeDtypeStruct((parts, 1, 1), jnp.float32),
        grid_spec=pltpu.PrefetchScalarGridSpec(
            num_scalar_prefetch=0,
            grid=(parts, tiles_per_part),
            in_specs=[pl.BlockSpec((tile_rows, n_cols), _idx),
                      pl.BlockSpec((tile_rows, n_cols), _idx)],
            out_specs=pl.BlockSpec((1, 1, 1), lambda c, j: (c, 0, 0)),
            scratch_shapes=[pltpu.VMEM((1, n_cols), jnp.float32)],
        ),
        compiler_params=pltpu.CompilerParams(
            dimension_semantics=("parallel", "arbitrary"),
            vmem_limit_bytes=_VMEM_LIMIT_BYTES),
    )(logit2d, label2d)
    return jnp.sum(partials)


def generator_loss(fake_out, fake_logit=None, label=None, aux_weight=0.1,
                   loss_type="hinge", *, force_pallas=False,
                   out_tile_rows=_DEF_OUT_TILE_ROWS, aux_tile_rows=None):
    """Pallas-TPU equivalent of GeneratorLoss(lossType).forward(...)."""
    if loss_type not in ("hinge", "bce"):
        raise ValueError(f"unknown loss_type: {loss_type}")

    small = fake_out.size < _SMALL_SIZE_THRESHOLD and (
        fake_logit is None or fake_logit.size < _SMALL_SIZE_THRESHOLD)
    if small and not force_pallas:
        # Small GAN heads: a single XLA-fused reduction beats kernel-launch cost.
        return _ref_loss(fake_out, fake_logit, label, aux_weight, loss_type)

    base = _neg_mean_pallas(fake_out, max_tile_rows=out_tile_rows)
    if fake_logit is None or label is None:
        return base
    # (Possible further optimization: fuse both reductions into one pallas_call
    #  with two scalar outputs to save a launch; kept separate for clarity.)
    return base + _aux_loss_pallas(fake_logit, label, aux_weight, loss_type,
                                   max_tile_rows=aux_tile_rows)


# ------------------------- pure-JAX reference ------------------------------ #

def _ref_loss(fake_out, fake_logit=None, label=None,
              aux_weight=0.1, loss_type="hinge"):
    base = -jnp.mean(fake_out.astype(jnp.float32))
    if fake_logit is None or label is None:
        return base
    x = fake_logit.astype(jnp.float32)
    y = label.astype(jnp.float32)
    if loss_type == "hinge":
        c = y * 2.0 - 1.0
        cls = jnp.mean(jnp.sum(jax.nn.relu(1.0 - x * c), axis=-1))
    else:
        # Naive sigmoid+log form exactly mirrors the PyTorch module; only used
        # as a test reference (can produce inf/nan for extreme logits).
        sig = jax.nn.sigmoid(x)
        cls = -jnp.mean(y * jnp.log(sig) + (1.0 - y) * jnp.log(1.0 - sig))
    return base + aux_weight * cls


# --------------------------------- main ------------------------------------ #

if __name__ == "__main__":
    key = jax.random.PRNGKey(0)
    ks = jax.random.split(key, 6)

    # Small shapes consistent with a GAN head: patch-discriminator output plus
    # auxiliary classification logits/labels.
    fake_out = jax.random.normal(ks[0], (2, 1, 24, 24), dtype=jnp.float32)  # 1152
    fake_logit = jax.random.normal(ks[1], (8, 12), dtype=jnp.float32)
    label = (jax.random.uniform(ks[2], (8, 12)) > 0.5).astype(jnp.float32)

    cases = []
    # 1) no aux loss -> -mean(fakeOut)
    cases.append((generator_loss(fake_out, force_pallas=True),
                  _ref_loss(fake_out)))
    # 2) hinge aux loss
    cases.append((generator_loss(fake_out, fake_logit, label, 0.1, "hinge",
                                 force_pallas=True),
                  _ref_loss(fake_out, fake_logit, label, 0.1, "hinge")))
    # 3) bce aux loss (stable in-kernel form vs. naive reference)
    cases.append((generator_loss(fake_out, fake_logit, label, 0.1, "bce",
                                 force_pallas=True),
                  _ref_loss(fake_out, fake_logit, label, 0.1, "bce")))

    # 4/5) exercise multi-tile grids, the 2-partial "parallel" axis, ragged
    #      tails, partial-edge-block masking and clamped out-of-range blocks
    #      via tiny tile overrides.
    fo2 = jax.random.normal(ks[3], (4, 1, 40, 41), dtype=jnp.float32)       # 6560
    lg2 = jax.random.normal(ks[4], (60, 12), dtype=jnp.float32)
    lb2 = (jax.random.uniform(ks[5], (60, 12)) > 0.5).astype(jnp.float32)
    cases.append((generator_loss(fo2, lg2, lb2, 0.25, "hinge",
                                 force_pallas=True,
                                 out_tile_rows=16, aux_tile_rows=16),
                  _ref_loss(fo2, lg2, lb2, 0.25, "hinge")))
    cases.append((generator_loss(fo2, lg2, lb2, 0.25, "bce",
                                 force_pallas=True,
                                 out_tile_rows=16, aux_tile_rows=24),
                  _ref_loss(fo2, lg2, lb2, 0.25, "bce")))

    for got, want in cases:
        got = jax.block_until_ready(got)
        assert np.allclose(np.asarray(got), np.asarray(want),
                           rtol=1e-5, atol=1e-5), (got, want)

    print("KERNEL_OK")
</pallas_src>

<mosaic_0001>
module attributes {stable_mosaic.version = 11 : i64} {
  func.func @_neg_sum_kernel(%arg0: i32, %arg1: i32, %arg2: memref<8x128xf32, #tpu.memory_space<vmem>>, %arg3: memref<1x1x1xf32, #tpu.memory_space<vmem>>, %arg4: memref<8x128xf32, #tpu.memory_space<vmem>>) attributes {dimension_semantics = [#tpu.dimension_semantics<parallel>, #tpu.dimension_semantics<arbitrary>], iteration_bounds = array<i64: 1, 1>, scalar_prefetch = 0 : i64, scratch_operands = 1 : i64, tpu.core_type = #tpu.core_type<tc>, window_params = [{transform_indices = @transform_0, window_bounds = array<i64: 8, 128>}, {transform_indices = @transform_1, window_bounds = array<i64: 1, 1, 1>}]} {
    %c0_i32 = arith.constant 0 : i32
    %0 = arith.cmpi eq, %arg1, %c0_i32 : i32
    %1 = arith.extui %0 : i1 to i32
    %c0_i32_0 = arith.constant 0 : i32
    %2 = arith.cmpi ne, %1, %c0_i32_0 : i32
    scf.if %2 {
      %cst_8 = arith.constant 0.000000e+00 : f32
      %12 = vector.broadcast %cst_8 : f32 to vector<8x128xf32>
      %c0_9 = arith.constant 0 : index
      %c0_10 = arith.constant 0 : index
      %13 = vector.load %arg4[%c0_9, %c0_10] : memref<8x128xf32, #tpu.memory_space<vmem>>, vector<8x128xf32>
      tpu.vector_store %arg4[%c0_9, %c0_10], %12 {strides = array<i32>} : memref<8x128xf32, #tpu.memory_space<vmem>>, vector<8x128xf32>,
    } else {
    }
    %c0 = arith.constant 0 : index
    %c0_1 = arith.constant 0 : index
    %3 = vector.load %arg2[%c0, %c0_1] : memref<8x128xf32, #tpu.memory_space<vmem>>, vector<8x128xf32>
    %c0_2 = arith.constant 0 : index
    %c0_3 = arith.constant 0 : index
    %4 = vector.load %arg4[%c0_2, %c0_3] : memref<8x128xf32, #tpu.memory_space<vmem>>, vector<8x128xf32>
    %5 = vector.shape_cast %3 : vector<8x128xf32> to vector<1x8x128xf32>
    %cst = arith.constant dense<0.000000e+00> : vector<8x128xf32>
    %6 = vector.multi_reduction <add>, %5, %cst [0] : vector<1x8x128xf32> to vector<8x128xf32>
    %7 = arith.addf %4, %6 : vector<8x128xf32>
    %c0_4 = arith.constant 0 : index
    %c0_5 = arith.constant 0 : index
    %8 = vector.load %arg4[%c0_4, %c0_5] : memref<8x128xf32, #tpu.memory_space<vmem>>, vector<8x128xf32>
    tpu.vector_store %arg4[%c0_4, %c0_5], %7 {strides = array<i32>} : memref<8x128xf32, #tpu.memory_space<vmem>>, vector<8x128xf32>,
    %c0_i32_6 = arith.constant 0 : i32
    %9 = arith.cmpi eq, %arg1, %c0_i32_6 : i32
    %10 = arith.extui %9 : i1 to i32
    %c0_i32_7 = arith.constant 0 : i32
    %11 = arith.cmpi ne, %10, %c0_i32_7 : i32
    scf.if %11 {
      %c0_8 = arith.constant 0 : index
      %c0_9 = arith.constant 0 : index
      %12 = vector.load %arg4[%c0_8, %c0_9] : memref<8x128xf32, #tpu.memory_space<vmem>>, vector<8x128xf32>
      %13 = vector.shape_cast %12 : vector<8x128xf32> to vector<1x8x128xf32>
      %cst_10 = arith.constant dense<0.000000e+00> : vector<1xf32>
      %14 = vector.multi_reduction <add>, %13, %cst_10 [1, 2] : vector<1x8x128xf32> to vector<1xf32>
      %15 = vector.shape_cast %14 : vector<1xf32> to vector<1x1x1xf32>
      %16 = vector.extract %15[0, 0, 0] : f32 from vector<1x1x1xf32>
      %cst_11 = arith.constant -8.68055562E-4 : f32
      %17 = arith.mulf %16, %cst_11 : f32
      %18 = vector.broadcast %17 : f32 to vector<1x1x1xf32>
      %c0_12 = arith.constant 0 : index
      %c0_13 = arith.constant 0 : index
      %c0_14 = arith.constant 0 : index
      %19 = vector.load %arg3[%c0_12, %c0_13, %c0_14] : memref<1x1x1xf32, #tpu.memory_space<vmem>>, vector<1x1x1xf32>
      tpu.vector_store %arg3[%c0_12, %c0_13, %c0_14], %18 {strides = array<i32>} : memref<1x1x1xf32, #tpu.memory_space<vmem>>, vector<1x1x1xf32>,
    } else {
    }
    return
  }
  func.func @transform_0(%arg0: i32, %arg1: i32) -> (i32, i32) {
    %c1_i32 = arith.constant 1 : i32
    %0 = arith.muli %arg0, %c1_i32 : i32
    %1 = arith.addi %0, %arg1 : i32
    %c0_i32 = arith.constant 0 : i32
    %2 = arith.minsi %1, %c0_i32 : i32
    %c0_i32_0 = arith.constant 0 : i32
    %c0_i32_1 = arith.constant 0 : i32
    return %2, %c0_i32_0 : i32, i32
  }
  func.func @transform_1(%arg0: i32, %arg1: i32) -> (i32, i32, i32) {
    %c0_i32 = arith.constant 0 : i32
    %c0_i32_0 = arith.constant 0 : i32
    %c0_i32_1 = arith.constant 0 : i32
    return %arg0, %c0_i32, %c0_i32_0 : i32, i32, i32
  }
}

</mosaic_0001>

<bundles_post_ra>
// kernel: tpu_custom_call.1
= control target key start
LH: loop header
LB: loop body
LE: loop exit
PB: predicated region body
PF: predicated region fallthrough
CT: control target
= control target key end

     0   :  { %6 = vsyncpa [#allocation4], 0  ;;  %s139_s0 = inlined_call_operand.hbm [shape: f32[8,128], index: 0, kind: input, shape index: {}]   ;;  %s140_s1 = inlined_call_operand.hbm [shape: f32[1,1,1], index: 1, kind: output, shape index: {}]  }
   0x1   :  { %7 = vsyncpa [#allocation5], 0  ;;  %s121_s6 = smov [#allocation3]  }
   0x2   :  { %s19_s7 = sshll.u32 %s121_s6, 4  ;;  %s20_s7 = int_to_ptr.vmem [resolvable:$true] %s19_s7 }
   0x3   :  { %s85_s8 = scalar_lea.vmem %s20_s7, 128  ;;  %p90_p1 = scmp.lt.s32.totalorder %s20_s7, %s20_s7 }
   0x4   :  { %p86_p0 = scmp.ne.s32.totalorder %s20_s7, %s85_s8  ;;  %p91_p2 = scmp.lt.s32.totalorder %s85_s8, %s85_s8 }
   0x6   :  { %p92_p3 = por %p91_p2, %p90_p1 }
   0x8   :  { %p93_p4 = pnand %p92_p3, %p86_p0 }
   0xa   :  { %96 = shalt.err (!%p93_p4)
}
   0xb   :  { %22 = dma.hbm_to_vmem [thread:$0]  %s139_s0, 128, %s20_s7, [#allocation4]  }
   0xc   :  { %117 = dma.done.wait [#allocation4], 128  }
   0xd   :  { %118 = vsyncadd [#allocation4], 4294967168  ;;  %v34_v0 = vld [vmem:[#allocation3] sm:$0xff]  ;;  %s122_s11 = smov [#allocation6]   ;;  %vm54_vm0 = vcmask 0  }
   0xe   :  { %43 = vadd.xlane.f32.xlu0 %v34_v0  ;;  %s62_s12 = sshll.u32 %s122_s11, 4  ;;  %s63_s12 = int_to_ptr.vmem [resolvable:$true] %s62_s12 }
   0xf   :  { %s97_s0 = scalar_lea.vmem %s63_s12, 16  ;;  %s101_s15 = scalar_lea.vmem %s63_s12, 32 }
  0x10   :  { %p98_p5 = scmp.ne.s32.totalorder %s63_s12, %s97_s0  ;;  %p102_p6 = scmp.lt.s32.totalorder %s63_s12, %s63_s12 }
  0x11   :  { %p103_p7 = scmp.lt.s32.totalorder %s101_s15, %s97_s0 }
  0x13   :  { %p104_p8 = por %p103_p7, %p102_p6 }
  0x15   :  { %p105_p9 = pnand %p104_p8, %p98_p5 }
  0x97   :  { %v44_v1 = vpop.xlane.xlu0 %43 }
  0x98   :  { %v45_v2 = vrot.slane %v44_v1, 4 }
  0x9a   :  { %v46_v3 = vadd.f32 %v45_v2, %v44_v1 }
  0x9c   :  { %v47_v4 = vrot.slane %v46_v3, 2 }
  0x9e   :  { %v48_v5 = vadd.f32 %v47_v4, %v46_v3 }
  0xa0   :  { %v49_v6 = vrot.slane %v48_v5, 1 }
  0xa2   :  { %v50_v7 = vadd.f32 %v49_v6, %v48_v5 }
  0xa4   :  { %73 = vpush %v50_v7 }
  0xd5   :  { %s74_s13 = spop %73 }
  0xd6   :  { %s52_s14 = smul.f32 -0.00086805556, %s74_s13 }
  0xd8   :  { %v53_v8 = vstv %s52_s14 }
  0xd9   :  { %55 = vst.msk [vmem:[#allocation6] sm:$0x1] %vm54_vm0, %v53_v8 }
  0xda   :  { %108 = shalt.err (!%p105_p9)
}
  0xdb   :  { %65 = dma.vmem_to_hbm [thread:$0]  %s63_s12, 16, %s140_s1, [#allocation5]  }
  0xdc   :  { %119 = dma.done.wait [#allocation5], 16  }
  0xdd   :  { %120 = vsyncadd [#allocation5], 4294967280 }
  0xde   :  { %69 = vsyncpa [#allocation4], 1 }
  0xdf   :  { %70 = vsyncpa [#allocation5], 1 }

</bundles_post_ra>
